<compile_context>
chip_gen: v7x
topology: tpu7x:2x2x1
jax: 0.10.0
libtpu: 0.0.40
codegen_flags: <defaults>
</compile_context>

<pallas_src>
import math

import jax
import jax.numpy as jnp
from jax.experimental import pallas as pl
from jax.experimental.pallas import tpu as pltpu


# -----------------------------------------------------------------------------
# small config (mirrors the ModelArgs fields MoE.forward actually uses)
# -----------------------------------------------------------------------------
BATCH = 2
SEQ = 8
DIM = 32                # args.dim
MOE_INTER = 64          # args.moe_inter_dim
N_EXPERTS = 8           # args.n_routed_experts
TOPK = 2                # args.n_activated_experts
N_SHARED = 2            # args.n_shared_experts
SHARED_INTER = N_SHARED * MOE_INTER
ROUTE_SCALE = 1.0       # args.route_scale
# score_func = "softmax", n_expert_groups = 1, gate bias = None (dim != 7168)


# -----------------------------------------------------------------------------
# Grouped-MoE kernel: one (TT, D) assignment tile x one intermediate slab of ONE
# expert (selected via scalar-prefetched per-block expert id).
# -----------------------------------------------------------------------------
def moe_group_kernel(block_expert_ref,      # SMEM (NB,) int32 scalar prefetch (index_maps only)
                     x_ref,                 # (TT, D)   bf16 expert-sorted tokens
                     rw_ref,                # (TT, 1)   f32  per-assignment routing weight
                     w1_ref, w3_ref,        # (1, D, TI) bf16 K-major up-proj slabs
                     w2_ref,                # (1, TI, D) bf16 K-major down-proj slab
                     o_ref,                 # (TT, D)   bf16
                     acc_ref):              # (TT, D)   f32 scratch accumulator
    del block_expert_ref
    ni = pl.program_id(1)

    @pl.when(ni == 0)
    def _init():
        acc_ref[...] = jnp.zeros_like(acc_ref)

    x = x_ref[...]
    h1 = jnp.dot(x, w1_ref[0], preferred_element_type=jnp.float32)     # MXU, f32 acc
    h3 = jnp.dot(x, w3_ref[0], preferred_element_type=jnp.float32)     # MXU, f32 acc
    h = (jax.nn.silu(h1) * h3).astype(jnp.bfloat16)                     # EUP + VPU
    acc_ref[...] += jnp.dot(h, w2_ref[0], preferred_element_type=jnp.float32)

    @pl.when(ni == pl.num_programs(1) - 1)
    def _store():
        # Routing weight applied once per assignment, after the full down-projection.
        # TODO(synk): at D < 128 this store is lane-masked; pad D at production sizes.
        o_ref[...] = (acc_ref[...] * rw_ref[...]).astype(o_ref.dtype)


# -----------------------------------------------------------------------------
# Static tile-size selection
# -----------------------------------------------------------------------------
def _pick_token_tile(n_assign):
    # Large enough that streamed weight DMA hides under MXU work; small enough that
    # per-expert-group padding stays cheap.
    if n_assign >= 8192:
        return 512
    if n_assign >= 2048:
        return 256
    if n_assign >= 512:
        return 64
    return 16


def _pick_inter_tile(dim, inter, budget_bytes=24 * 1024 * 1024):
    """Largest intermediate tile (full `inter` or a 128-multiple divisor of it) whose
    three double-buffered bf16 weight tiles fit within `budget_bytes` of VMEM."""
    def w_bytes(t):
        return 3 * 2 * 2 * dim * t   # 3 matrices * 2 pipeline buffers * 2 B/elem
    if w_bytes(inter) <= budget_bytes:
        return inter
    t = (inter // 128) * 128
    while t >= 128:
        if inter % t == 0 and w_bytes(t) <= budget_bytes:
            return t
        t -= 128
    # TODO(synk): support a masked partial last tile when `inter` has no fitting
    # 128-multiple divisor.
    return inter


# -----------------------------------------------------------------------------
# One-time (init-time) weight relayout: stack routed experts + shared-MLP chunks
# K-major so the kernel never relayouts weight tiles on the hot path.
# -----------------------------------------------------------------------------
def prepare_moe_params(params):
    D, I, S = DIM, MOE_INTER, N_SHARED
    # routed experts: PyTorch (out, in) -> K-major
    w1r = jnp.transpose(params["w1"], (0, 2, 1))                     # (E, D, I)
    w3r = jnp.transpose(params["w3"], (0, 2, 1))                     # (E, D, I)
    w2r = jnp.transpose(params["w2"], (0, 2, 1))                     # (E, I, D)
    # shared MLP split exactly into S chunks of inter dim I (SwiGLU is elementwise
    # over the inter axis, so chunk outputs sum to the full MLP output)
    w1s = jnp.transpose(params["ws1"].reshape(S, I, D), (0, 2, 1))   # (S, D, I)
    w3s = jnp.transpose(params["ws3"].reshape(S, I, D), (0, 2, 1))   # (S, D, I)
    w2s = jnp.transpose(params["ws2"].reshape(D, S, I), (1, 2, 0))   # (S, I, D)
    return {
        "wg": params["wg"],
        "w1": jnp.concatenate([w1r, w1s], axis=0),                   # (E+S, D, I)
        "w3": jnp.concatenate([w3r, w3s], axis=0),                   # (E+S, D, I)
        "w2": jnp.concatenate([w2r, w2s], axis=0),                   # (E+S, I, D)
    }


# -----------------------------------------------------------------------------
# Forward: gate + routing/sort glue in XLA, one grouped pallas_call for all
# routed-expert AND shared-expert compute.
# -----------------------------------------------------------------------------
@jax.jit
def moe_forward(x, stacked):
    shape = x.shape
    D = shape[-1]
    T = math.prod(shape[:-1])
    E, I, K, S = N_EXPERTS, MOE_INTER, TOPK, N_SHARED
    Etot = E + S
    xf = x.reshape(T, D)

    # --- gate: tiny (T, E) matmul + softmax + top-k, plain XLA ---------------
    logits = jax.lax.dot_general(xf, stacked["wg"], (((1,), (1,)), ((), ())),
                                 preferred_element_type=jnp.float32)
    logits = logits.astype(jnp.bfloat16).astype(jnp.float32)   # F.linear output dtype
    scores = jax.nn.softmax(logits, axis=-1)
    top_w, top_idx = jax.lax.top_k(scores, K)
    top_w = (top_w * ROUTE_SCALE).astype(xf.dtype)              # weights.type_as(x)

    # --- build the expert-sorted assignment list (top-k only + shared chunks) -
    n_assign = T * (K + S)
    TT = _pick_token_tile(n_assign)
    TI = _pick_inter_tile(D, I)
    NI = I // TI
    # static worst-case block count: each nonzero expert adds at most 1 partial block
    NB = (T * K) // TT + min(E, T * K) + S * ((T + TT - 1) // TT)
    A = NB * TT

    flat_expert = jnp.concatenate(
        [top_idx.reshape(-1).astype(jnp.int32),
         jnp.repeat(jnp.arange(E, Etot, dtype=jnp.int32), T)])
    flat_token = jnp.concatenate(
        [jnp.repeat(jnp.arange(T, dtype=jnp.int32), K),
         jnp.tile(jnp.arange(T, dtype=jnp.int32), S)])
    flat_weight = jnp.concatenate(
        [top_w.reshape(-1).astype(jnp.float32),
         jnp.ones((T * S,), jnp.float32)])

    order = jnp.argsort(flat_expert)
    s_expert = flat_expert[order]
    s_token = flat_token[order]
    s_weight = flat_weight[order]

    counts = jnp.zeros((Etot,), jnp.int32).at[flat_expert].add(1)
    padded_counts = ((counts + TT - 1) // TT) * TT               # group-align to TT
    group_start = jnp.concatenate(
        [jnp.zeros((1,), jnp.int32), jnp.cumsum(padded_counts)[:-1].astype(jnp.int32)])
    raw_start = jnp.concatenate(
        [jnp.zeros((1,), jnp.int32), jnp.cumsum(counts)[:-1].astype(jnp.int32)])
    pos = group_start[s_expert] + (jnp.arange(n_assign, dtype=jnp.int32)
                                   - raw_start[s_expert])        # row in padded buffer

    gather_token = jnp.zeros((A,), jnp.int32).at[pos].set(s_token)
    row_weight = jnp.zeros((A, 1), jnp.float32).at[pos, 0].set(s_weight)

    blocks_per_group = padded_counts // TT
    block_expert = jnp.searchsorted(jnp.cumsum(blocks_per_group),
                                    jnp.arange(NB, dtype=jnp.int32),
                                    side="right").astype(jnp.int32)
    block_expert = jnp.minimum(block_expert, Etot - 1)           # unused tail blocks (weight 0)

    x_sorted = jnp.take(xf, gather_token, axis=0)                # (A, D) bf16 gather

    # VMEM working set; raise the scoped limit only when the defaults won't cover it
    vmem_need = (2 * TT * D * 2          # x tile, double-buffered (bf16)
                 + 2 * TT * 4            # routing-weight column (f32)
                 + 3 * 2 * D * TI * 2    # w1/w3/w2 tiles, double-buffered (bf16)
                 + 2 * TT * D * 2        # output tile (bf16)
                 + TT * D * 4)           # accumulator scratch (f32)
    vmem_limit = (min(2 * vmem_need, 64 * 1024 * 1024)
                  if vmem_need > 12 * 1024 * 1024 else None)

    out_rows = pl.pallas_call(
        moe_group_kernel,
        out_shape=jax.ShapeDtypeStruct((A, D), xf.dtype),
        grid_spec=pltpu.PrefetchScalarGridSpec(
            num_scalar_prefetch=1,
            grid=(NB, NI),
            in_specs=[
                pl.BlockSpec((TT, D), lambda b, ni, be: (b, 0)),
                pl.BlockSpec((TT, 1), lambda b, ni, be: (b, 0)),
                pl.BlockSpec((1, D, TI), lambda b, ni, be: (be[b], 0, ni)),
                pl.BlockSpec((1, D, TI), lambda b, ni, be: (be[b], 0, ni)),
                pl.BlockSpec((1, TI, D), lambda b, ni, be: (be[b], ni, 0)),
            ],
            out_specs=pl.BlockSpec((TT, D), lambda b, ni, be: (b, 0)),
            scratch_shapes=[pltpu.VMEM((TT, D), jnp.float32)],
        ),
        compiler_params=pltpu.CompilerParams(
            dimension_semantics=("parallel", "arbitrary"),
            vmem_limit_bytes=vmem_limit,
        ),
    )(block_expert, x_sorted, row_weight, stacked["w1"], stacked["w3"], stacked["w2"])

    # --- combine: scatter-add weighted expert outputs back to token order ----
    y = jnp.zeros((T, D), jnp.float32).at[gather_token].add(out_rows.astype(jnp.float32))
    return y.astype(x.dtype).reshape(shape)


# -----------------------------------------------------------------------------
# Pure-JAX reference (mirrors PyTorch forward semantics) for a sanity check
# -----------------------------------------------------------------------------
def _lin(x, w):
    """y = x @ w^T with f32 MXU accumulation, rounded to bf16 (mimics F.linear)."""
    y = jax.lax.dot_general(x, w, (((1,), (1,)), ((), ())),
                            preferred_element_type=jnp.float32)
    return y.astype(jnp.bfloat16)


def moe_reference(x, params):
    shape = x.shape
    xf = x.reshape(-1, shape[-1])
    T = xf.shape[0]
    logits = _lin(xf, params["wg"]).astype(jnp.float32)
    scores = jax.nn.softmax(logits, axis=-1)
    top_w, top_idx = jax.lax.top_k(scores, TOPK)
    top_w = (top_w * ROUTE_SCALE).astype(xf.dtype)
    dense_w = jnp.zeros((T, N_EXPERTS), xf.dtype).at[
        jnp.arange(T)[:, None], top_idx].add(top_w)

    acc = jnp.zeros((T, shape[-1]), jnp.float32)
    for e in range(N_EXPERTS):
        h1 = _lin(xf, params["w1"][e])
        h3 = _lin(xf, params["w3"][e])
        h = (jax.nn.silu(h1.astype(jnp.float32)).astype(jnp.bfloat16) * h3)
        out = _lin(h, params["w2"][e])
        acc = acc + (out * dense_w[:, e:e + 1]).astype(jnp.float32)
    y = acc.astype(xf.dtype)

    h1 = _lin(xf, params["ws1"])
    h3 = _lin(xf, params["ws3"])
    z = _lin(jax.nn.silu(h1.astype(jnp.float32)).astype(jnp.bfloat16) * h3,
             params["ws2"])
    return (y + z).reshape(shape)


# -----------------------------------------------------------------------------
# main
# -----------------------------------------------------------------------------
if __name__ == "__main__":
    key = jax.random.PRNGKey(0)
    ks = jax.random.split(key, 8)
    std = 0.05

    params = {
        # gate: (n_routed_experts, dim)
        "wg": (jax.random.normal(ks[0], (N_EXPERTS, DIM)) * std).astype(jnp.bfloat16),
        # routed experts: stacked PyTorch-layout weights (out_features, in_features)
        "w1": (jax.random.normal(ks[1], (N_EXPERTS, MOE_INTER, DIM)) * std).astype(jnp.bfloat16),
        "w2": (jax.random.normal(ks[2], (N_EXPERTS, DIM, MOE_INTER)) * std).astype(jnp.bfloat16),
        "w3": (jax.random.normal(ks[3], (N_EXPERTS, MOE_INTER, DIM)) * std).astype(jnp.bfloat16),
        # shared experts (MLP with inter = n_shared_experts * moe_inter_dim)
        "ws1": (jax.random.normal(ks[4], (SHARED_INTER, DIM)) * std).astype(jnp.bfloat16),
        "ws2": (jax.random.normal(ks[5], (DIM, SHARED_INTER)) * std).astype(jnp.bfloat16),
        "ws3": (jax.random.normal(ks[6], (SHARED_INTER, DIM)) * std).astype(jnp.bfloat16),
    }

    x = (jax.random.normal(ks[7], (BATCH, SEQ, DIM)) * 0.5).astype(jnp.bfloat16)

    stacked = prepare_moe_params(params)          # init-time relayout (not per-call)

    out = moe_forward(x, stacked)
    out = jax.block_until_ready(out)

    ref = moe_reference(x, params)
    assert out.shape == x.shape and out.dtype == x.dtype
    err = jnp.max(jnp.abs(out.astype(jnp.float32) - ref.astype(jnp.float32)))
    assert float(err) < 5e-2, f"mismatch vs reference: max abs err = {float(err)}"

    print("KERNEL_OK")
</pallas_src>

<mosaic_0001>
module attributes {stable_mosaic.version = 11 : i64} {
  func.func private @main(%arg0: i32) attributes {dimension_semantics = [#tpu.dimension_semantics<core_parallel>], iteration_bounds = array<i64: 2>, tpu.core_type = #tpu.core_type<sc_scalar_subcore>, window_params = []} {
    return
  }
}

module attributes {stable_mosaic.version = 11 : i64} {
  func.func private @main(%arg0: i32) attributes {dimension_semantics = [#tpu.dimension_semantics<core_parallel>], iteration_bounds = array<i64: 2>, tpu.core_type = #tpu.core_type<sc_scalar_subcore>, window_params = []} {
    return
  }
}

module attributes {stable_mosaic.version = 11 : i64} {
  func.func @moe_group_kernel(%arg0: i32, %arg1: i32, %arg2: memref<12xi32, #tpu.memory_space<smem>>, %arg3: memref<16x32xbf16, #tpu.memory_space<vmem>>, %arg4: memref<16x1xf32, #tpu.memory_space<vmem>>, %arg5: memref<1x32x64xbf16, #tpu.memory_space<vmem>>, %arg6: memref<1x32x64xbf16, #tpu.memory_space<vmem>>, %arg7: memref<1x64x32xbf16, #tpu.memory_space<vmem>>, %arg8: memref<16x32xbf16, #tpu.memory_space<vmem>>, %arg9: memref<16x32xf32, #tpu.memory_space<vmem>>) attributes {dimension_semantics = [#tpu.dimension_semantics<parallel>, #tpu.dimension_semantics<arbitrary>], iteration_bounds = array<i64: 12, 1>, scalar_prefetch = 1 : i64, scratch_operands = 1 : i64, tpu.core_type = #tpu.core_type<tc>, window_params = [{transform_indices = @transform_0, window_bounds = array<i64: 16, 32>}, {transform_indices = @transform_1, window_bounds = array<i64: 16, 1>}, {transform_indices = @transform_2, window_bounds = array<i64: 1, 32, 64>}, {transform_indices = @transform_3, window_bounds = array<i64: 1, 32, 64>}, {transform_indices = @transform_4, window_bounds = array<i64: 1, 64, 32>}, {transform_indices = @transform_5, window_bounds = array<i64: 16, 32>}]} {
    %c0_i32 = arith.constant 0 : i32
    %0 = arith.cmpi eq, %arg1, %c0_i32 : i32
    %1 = arith.extui %0 : i1 to i32
    %c0_i32_0 = arith.constant 0 : i32
    %2 = arith.cmpi ne, %1, %c0_i32_0 : i32
    scf.if %2 {
      %cst_20 = arith.constant 0.000000e+00 : f32
      %27 = vector.broadcast %cst_20 : f32 to vector<16x32xf32>
      %c0_21 = arith.constant 0 : index
      %c0_22 = arith.constant 0 : index
      %28 = vector.load %arg9[%c0_21, %c0_22] : memref<16x32xf32, #tpu.memory_space<vmem>>, vector<16x32xf32>
      tpu.vector_store %arg9[%c0_21, %c0_22], %27 {strides = array<i32>} : memref<16x32xf32, #tpu.memory_space<vmem>>, vector<16x32xf32>,
    } else {
    }
    %c0 = arith.constant 0 : index
    %c0_1 = arith.constant 0 : index
    %3 = vector.load %arg3[%c0, %c0_1] : memref<16x32xbf16, #tpu.memory_space<vmem>>, vector<16x32xbf16>
    %c0_2 = arith.constant 0 : index
    %c0_3 = arith.constant 0 : index
    %c0_4 = arith.constant 0 : index
    %4 = vector.load %arg5[%c0_2, %c0_3, %c0_4] : memref<1x32x64xbf16, #tpu.memory_space<vmem>>, vector<1x32x64xbf16>
    %5 = vector.shape_cast %4 : vector<1x32x64xbf16> to vector<32x64xbf16>
    %cst = arith.constant dense<0.000000e+00> : vector<16x64xf32>
    %6 = tpu.matmul %3, %5, %cst {dimension_numbers = #tpu.dot_dimension_numbers<[1], [0], [0], [1], [0, 0, 1, 1], [], []>} : vector<16x32xbf16>, vector<32x64xbf16>, vector<16x64xf32> -> vector<16x64xf32>
    %c0_5 = arith.constant 0 : index
    %c0_6 = arith.constant 0 : index
    %c0_7 = arith.constant 0 : index
    %7 = vector.load %arg6[%c0_5, %c0_6, %c0_7] : memref<1x32x64xbf16, #tpu.memory_space<vmem>>, vector<1x32x64xbf16>
    %8 = vector.shape_cast %7 : vector<1x32x64xbf16> to vector<32x64xbf16>
    %cst_8 = arith.constant dense<0.000000e+00> : vector<16x64xf32>
    %9 = tpu.matmul %3, %8, %cst_8 {dimension_numbers = #tpu.dot_dimension_numbers<[1], [0], [0], [1], [0, 0, 1, 1], [], []>} : vector<16x32xbf16>, vector<32x64xbf16>, vector<16x64xf32> -> vector<16x64xf32>
    %10 = arith.negf %6 : vector<16x64xf32>
    %11 = math.exp %10 : vector<16x64xf32>
    %cst_9 = arith.constant 1.000000e+00 : f32
    %12 = vector.broadcast %cst_9 : f32 to vector<16x64xf32>
    %13 = arith.addf %12, %11 : vector<16x64xf32>
    %14 = arith.divf %12, %13 : vector<16x64xf32>
    %15 = arith.mulf %6, %14 : vector<16x64xf32>
    %16 = arith.mulf %15, %9 : vector<16x64xf32>
    %17 = arith.truncf %16 : vector<16x64xf32> to vector<16x64xbf16>
    %c0_10 = arith.constant 0 : index
    %c0_11 = arith.constant 0 : index
    %18 = vector.load %arg9[%c0_10, %c0_11] : memref<16x32xf32, #tpu.memory_space<vmem>>, vector<16x32xf32>
    %c0_12 = arith.constant 0 : index
    %c0_13 = arith.constant 0 : index
    %c0_14 = arith.constant 0 : index
    %19 = vector.load %arg7[%c0_12, %c0_13, %c0_14] : memref<1x64x32xbf16, #tpu.memory_space<vmem>>, vector<1x64x32xbf16>
    %20 = vector.shape_cast %19 : vector<1x64x32xbf16> to vector<64x32xbf16>
    %cst_15 = arith.constant dense<0.000000e+00> : vector<16x32xf32>
    %21 = tpu.matmul %17, %20, %cst_15 {dimension_numbers = #tpu.dot_dimension_numbers<[1], [0], [0], [1], [0, 0, 1, 1], [], []>} : vector<16x64xbf16>, vector<64x32xbf16>, vector<16x32xf32> -> vector<16x32xf32>
    %22 = arith.addf %18, %21 : vector<16x32xf32>
    %c0_16 = arith.constant 0 : index
    %c0_17 = arith.constant 0 : index
    %23 = vector.load %arg9[%c0_16, %c0_17] : memref<16x32xf32, #tpu.memory_space<vmem>>, vector<16x32xf32>
    tpu.vector_store %arg9[%c0_16, %c0_17], %22 {strides = array<i32>} : memref<16x32xf32, #tpu.memory_space<vmem>>, vector<16x32xf32>,
    %c0_i32_18 = arith.constant 0 : i32
    %24 = arith.cmpi eq, %arg1, %c0_i32_18 : i32
    %25 = arith.extui %24 : i1 to i32
    %c0_i32_19 = arith.constant 0 : i32
    %26 = arith.cmpi ne, %25, %c0_i32_19 : i32
    scf.if %26 {
      %c0_20 = arith.constant 0 : index
      %c0_21 = arith.constant 0 : index
      %27 = vector.load %arg9[%c0_20, %c0_21] : memref<16x32xf32, #tpu.memory_space<vmem>>, vector<16x32xf32>
      %c0_22 = arith.constant 0 : index
      %c0_23 = arith.constant 0 : index
      %28 = vector.load %arg4[%c0_22, %c0_23] : memref<16x1xf32, #tpu.memory_space<vmem>>, vector<16x1xf32>
      %29 = vector.broadcast %28 : vector<16x1xf32> to vector<16x32xf32>
      %30 = arith.mulf %27, %29 : vector<16x32xf32>
      %31 = arith.truncf %30 : vector<16x32xf32> to vector<16x32xbf16>
      %c0_24 = arith.constant 0 : index
      %c0_25 = arith.constant 0 : index
      %32 = vector.load %arg8[%c0_24, %c0_25] : memref<16x32xbf16, #tpu.memory_space<vmem>>, vector<16x32xbf16>
      tpu.vector_store %arg8[%c0_24, %c0_25], %31 {strides = array<i32>} : memref<16x32xbf16, #tpu.memory_space<vmem>>, vector<16x32xbf16>,
    } else {
    }
    return
  }
  func.func @transform_0(%arg0: i32, %arg1: i32, %arg2: memref<12xi32, #tpu.memory_space<smem>>) -> (i32, i32) {
    %c0_i32 = arith.constant 0 : i32
    %c0_i32_0 = arith.constant 0 : i32
    return %arg0, %c0_i32 : i32, i32
  }
  func.func @transform_1(%arg0: i32, %arg1: i32, %arg2: memref<12xi32, #tpu.memory_space<smem>>) -> (i32, i32) {
    %c0_i32 = arith.constant 0 : i32
    %c0_i32_0 = arith.constant 0 : i32
    return %arg0, %c0_i32 : i32, i32
  }
  func.func @transform_2(%arg0: i32, %arg1: i32, %arg2: memref<12xi32, #tpu.memory_space<smem>>) -> (i32, i32, i32) {
    %0 = arith.index_cast %arg0 : i32 to index
    %1 = memref.load %arg2[%0] : memref<12xi32, #tpu.memory_space<smem>>
    %c0_i32 = arith.constant 0 : i32
    %c0_i32_0 = arith.constant 0 : i32
    return %1, %c0_i32, %arg1 : i32, i32, i32
  }
  func.func @transform_3(%arg0: i32, %arg1: i32, %arg2: memref<12xi32, #tpu.memory_space<smem>>) -> (i32, i32, i32) {
    %0 = arith.index_cast %arg0 : i32 to index
    %1 = memref.load %arg2[%0] : memref<12xi32, #tpu.memory_space<smem>>
    %c0_i32 = arith.constant 0 : i32
    %c0_i32_0 = arith.constant 0 : i32
    return %1, %c0_i32, %arg1 : i32, i32, i32
  }
  func.func @transform_4(%arg0: i32, %arg1: i32, %arg2: memref<12xi32, #tpu.memory_space<smem>>) -> (i32, i32, i32) {
    %0 = arith.index_cast %arg0 : i32 to index
    %1 = memref.load %arg2[%0] : memref<12xi32, #tpu.memory_space<smem>>
    %c0_i32 = arith.constant 0 : i32
    %c0_i32_0 = arith.constant 0 : i32
    return %1, %arg1, %c0_i32 : i32, i32, i32
  }
  func.func @transform_5(%arg0: i32, %arg1: i32, %arg2: memref<12xi32, #tpu.memory_space<smem>>) -> (i32, i32) {
    %c0_i32 = arith.constant 0 : i32
    %c0_i32_0 = arith.constant 0 : i32
    return %arg0, %c0_i32 : i32, i32
  }
}

</mosaic_0001>

<bundles_post_ra>
// kernel: custom-call.1
= control target key start
LH: loop header
LB: loop body
LE: loop exit
PB: predicated region body
PF: predicated region fallthrough
CT: control target
= control target key end

     0   :  { %s6_s0 = inlined_call_operand.vmem [shape: u32[12], index: 0, kind: output, shape index: {}]  }

// kernel: moe_forward.1
= control target key start
LH: loop header
LB: loop body
LE: loop exit
PB: predicated region body
PF: predicated region fallthrough
CT: control target
= control target key end

     0   :  { %s1055_s0 = inlined_call_operand.vmem [shape: s32[12], index: 0, kind: input, shape index: {}]   ;;  %s1056_s1 = inlined_call_operand.vmem [shape: bf16[192,32], index: 1, kind: input, shape index: {}]   ;;  %s1057_s2 = inlined_call_operand.vmem [shape: f32[192,1], index: 2, kind: input, shape index: {}]   ;;  %s1058_s3 = inlined_call_operand.vmem [shape: bf16[10,32,64], index: 3, kind: input, shape index: {}]   ;;  %s1059_s4 = inlined_call_operand.vmem [shape: bf16[10,32,64], index: 4, kind: input, shape index: {}]   ;;  %s1060_s5 = inlined_call_operand.vmem [shape: bf16[10,64,32], index: 5, kind: input, shape index: {}]   ;;  %s1061_s6 = inlined_call_operand.vmem [shape: bf16[192,32], index: 6, kind: output, shape index: {}]  }
   0x1   :  { %s11_s23 = sshll.u32 %s1055_s0, 4  ;;  %s12_s23 = int_to_ptr.vmem [resolvable:$true] %s11_s23 }
   0x2   :  { %s907_s24 = scalar_lea.vmem %s12_s23, 16  ;;  %p912_p1 = scmp.lt.s32.totalorder %s12_s23, %s12_s23 }
   0x3   :  { %p908_p0 = scmp.ne.s32.totalorder %s12_s23, %s907_s24  ;;  %p913_p2 = scmp.lt.s32.totalorder %s907_s24, %s907_s24 }
   0x5   :  { %p914_p3 = por %p913_p2, %p912_p1 }
   0x7   :  { %p915_p4 = pnand %p914_p3, %p908_p0 }
   0x9   :  { %918 = shalt.err (!%p915_p4)  }
   0xa   :  { %s945_s25 = smov [#allocation4]  }
   0xb   :  { %14 = dma.vmem_to_smem %s12_s23, 16, %s945_s25, [#allocation3] }
   0xc   :  { %931 = dma.done.wait [#allocation3], 16 }
   0xd   :  { %932 = vsyncadd [#allocation3], 4294967280 }
   0xe   :  { %16 = sfence }
   0xf   :  { %s987_s26 = smov 0   ;;  %s989_s27 = smov 0  }
  0x10   :  { %s991_s28 = smov 0  }
  0x11 LB: > { %s34_s0 = sadd.s32 1, %s939_s27  ;;  %p786_p5 = scmp.ge.s32.totalorder %s943_s28, 1  ;;  %s943_s28 = sphi %s991_s28, %s22_s28   ;;  %s939_s27 = sphi %s989_s27, %s1063_s27   ;;  %s935_s26 = sphi %s987_s26, %s1062_s26  }
  0x12   : > { %p36_p6 = scmp.ge.s32.totalorder %s34_s0, 12  ;;  %p277_p7 = scmp.lt.s32.totalorder %s943_s28, 13 }
  0x14   : > { %s1065_s0 = smov (%p36_p6, %s34_s0), 0  ;;  %p278_p8 = pnand %p786_p5, %p277_p7 }
  0x15   : > { %s350_s29 = sld [smem:[#allocation4 + %s935_s26]] (!%p278_p8)  ;;  %s787_s30 = sshll.u32 (!%p278_p8), %s935_s26, 1  ;;  %vm393_vm0 = vcmask (!%p278_p8), 261120   ;;  %v946_v0 = vmov (!%p278_p8), 0.0   ;;  %vm947_vm1 = vmmov (!%p278_p8), 0   ;;  %v948_v10 = vmov (!%p278_p8), 0  }
  0x16   : > { %281 = sbr.rel (%p278_p8) target bundleno = 517 (0x205), region = 40  ;;  %833 = vmatprep.subr.bf16.mxu1 (!%p278_p8), %v946_v0  ;;  %837 = vmatprep.mubr.msk.bf16.mxu1 (!%p278_p8), %vm947_vm1, %v946_v0  ;;  %p339_p9 = scmp.lt.s32.totalorder (!%p278_p8), %s787_s30, 23  ;;  %394 = vst.msk [vmem:[#allocation2] sm:$0xff] (!%p278_p8), %vm393_vm0, %v946_v0  ;;  %395 = vst.msk [vmem:[#allocation2 + $0x8] sm:$0xff] (!%p278_p8), %vm393_vm0, %v946_v0  ;;  %vm572_vm2 = vcmask (!%p278_p8), 523264   ;;  %vm648_vm3 = vcmask (!%p278_p8), 257024  }
  0x17   : > { %s360_s7 = sld [smem:[#allocation4 + %s935_s26]] (!%p278_p8)  ;;  %849 = vmatprep.subr.bf16.mxu0 (!%p278_p8), %v946_v0  ;;  %857 = vmatprep.mubr.msk.bf16.mxu0 (!%p278_p8), %vm947_vm1, %v946_v0 }
  0x18   : > { %s370_s20 = sld [smem:[#allocation4 + %s935_s26]] (!%p278_p8)  ;;  %889 = vset.pattern.permute.xlu0 (!%p278_p8), %v948_v10 }
  0x1b   : > { %p351_p10 = scmp.lt.s32.totalorder (!%p278_p8), %s350_s29, 9 }
  0x1d   : > { %s1067_s30 = smov (!%p339_p9, %s787_s30), 23  ;;  %p361_p11 = scmp.lt.s32.totalorder %s360_s7, 9  ;;  %v538_v34 = vld [vmem:[#allocation2] sm:$0xff]  ;;  %v539_v36 = vld [vmem:[#allocation2 + $0x8] sm:$0xff] }
  0x1e   : > { %s788_s8 = sshll.u32 %s1067_s30, 2  ;;  %s1069_s29 = smov (!%p351_p10, %s350_s29), 9 }
  0x1f   : > { %s342_s11 = scalar_lea.vmem %s1056_s1, %s788_s8  ;;  %s1071_s7 = smov (!%p361_p11, %s360_s7), 9 }
  0x20   : > { %s817_s12 = sshll.u32 %s1069_s29, 4  ;;  %s818_s16 = sshll.u32 %s1071_s7, 4  ;;  %v892_v3 = vld [vmem:[%s342_s11] sm:$0xff]  }
  0x21   : > { %s358_s15 = scalar_lea.vmem %s1058_s3, %s817_s12  ;;  %s368_s19 = scalar_lea.vmem %s1059_s4, %s818_s16 }
  0x22   : > { %v890_v1 = vld [vmem:[%s358_s15] sm:$0xff]   ;;  %v891_v2 = vld [vmem:[%s358_s15 + $0x8] sm:$0xff]   ;;  %p372_p12 = scmp.lt.s32.totalorder %s370_s20, 9  ;;  %s790_s25 = sshll.u32 %s1067_s30, 3 }
  0x23   : > { %834 = vmatpush3.bf16.msra.mxu1 %v890_v1  ;;  %v893_v4 = vld [vmem:[%s368_s19] sm:$0xff]   ;;  %v894_v5 = vld [vmem:[%s368_s19 + $0x8] sm:$0xff]   ;;  %s348_s7 = scalar_lea.vmem %s1057_s2, %s790_s25  ;;  %s386_s11 = scalar_lea.vmem %s1061_s6, %s788_s8 }
  0x24   : > { %835 = vmatprep.subr.bf16.mxu1 %v946_v0  ;;  %s1073_s20 = smov (!%p372_p12, %s370_s20), 9  ;;  %v626_v11 = vld [vmem:[%s348_s7] sm:$0xff]  ;;  %v627_v12 = vld [vmem:[%s348_s7 + $0x8] sm:$0xff] }
  0x25   : > { %s819_s21 = sshll.u32 %s1073_s20, 5  ;;  %630 = vperm.xlu0 %889, %v626_v11  }
  0x26   : > { %s379_s24 = scalar_lea.vmem %s1060_s5, %s819_s21 }
  0x27   : > { %836 = vmatpush3.bf16.msra.mxu1 %v891_v2  ;;  %v895_v6 = vld [vmem:[%s379_s24] sm:$0xff]   ;;  %v896_v7 = vld [vmem:[%s379_s24 + $0x8] sm:$0xff]   ;;  %v897_v8 = vld [vmem:[%s379_s24 + $0x10] sm:$0xff]  }
  0x28   : > { %841 = vmatprep.subr.bf16.mxu1 %v946_v0  ;;  %850 = vmatpush3.bf16.msra.mxu0 %v895_v6  ;;  %v898_v9 = vld [vmem:[%s379_s24 + $0x18] sm:$0xff]  }
  0x29   : > { %851 = vmatprep.subr.bf16.mxu0 %v946_v0  ;;  %635 = vperm.xlu0 %889, %v627_v12  }
  0x2a   : > { %838 = vmatmul.mubr.msk.bf16.vlgmr.msra.gmra.mrb[0].mxu1 %vm393_vm0, %v892_v3 }
  0x2b   : > { %842 = vmatpush3.bf16.msra.mxu1 %v893_v4  ;;  %845 = vmatprep.mubr.msk.bf16.mxu1 %vm947_vm1, %v946_v0 }
  0x2c   : > { %843 = vmatprep.subr.bf16.mxu1 %v946_v0  ;;  %852 = vmatpush3.bf16.msra.mxu0 %v896_v7 }
  0x2d   : > { %853 = vmatprep.subr.bf16.mxu0 %v946_v0 }
  0x2f   : > { %844 = vmatpush3.bf16.msra.mxu1 %v894_v5 }
  0x30   : > { %854 = vmatpush3.bf16.msra.mxu0 %v897_v8 }
  0x31   : > { %855 = vmatprep.subr.bf16.mxu0 %v946_v0 }
  0x32   : > { %846 = vmatmul.mubr.msk.bf16.vlgmr.msra.gmra.mrb[4].mxu1 %vm393_vm0, %v892_v3 }
  0x34   : > { %856 = vmatpush3.bf16.msra.mxu0 %v898_v9 }
  0xa4   : > { %v631_v42 = vpop.permute.xlu0 %630 }
  0xa8   : > { %v636_v45 = vpop.permute.xlu0 %635 }
  0xfd   : > { %v457_v13 = vpop.f32.mrb[0].mxu1 }
  0xfe   : > { %v806_v14 = vmul.f32 -1.442695, %v457_v13  ;;  %v839_v15 = vpop.f32.mrb[1].mxu1 }
  0xff   : > { %v460_v16 = vpop.f32.mrb[2].mxu1 }
 0x100   : > { %899 = vpow2.f32 %v806_v14  ;;  %v807_v17 = vmul.f32 -1.442695, %v460_v16  ;;  %v840_v18 = vpop.f32.mrb[3].mxu1 }
 0x102   : > { %901 = vpow2.f32 %v807_v17 }
 0x105   : > { %v514_v19 = vpop.f32.mrb[4].mxu1 }
 0x106   : > { %v847_v20 = vpop.f32.mrb[5].mxu1 }
 0x107   : > { %v517_v21 = vpop.f32.mrb[6].mxu1 }
 0x108   : > { %v848_v22 = vpop.f32.mrb[7].mxu1 }
 0x10a   : > { %v900_v23 = vpop.eup %899 }
 0x10b   : > { %v527_v24 = vadd.f32 1.0, %v900_v23 }
 0x10c   : > { %v902_v25 = vpop.eup %901 }
 0x10d   : > { %903 = vrcp.f32 %v527_v24  ;;  %v528_v26 = vadd.f32 1.0, %v902_v25 }
 0x10f   : > { %905 = vrcp.f32 %v528_v26 }
 0x117   : > { %v904_v27 = vpop.eup %903 }
 0x118   : > { %v533_v28 = vmul.f32 %v904_v27, %v457_v13 }
 0x119   : > { %v906_v29 = vpop.eup %905 }
 0x11a   : > { %v534_v30 = vmul.f32 %v906_v29, %v460_v16  ;;  %v535_v31 = vmul.f32 %v533_v28, %v514_v19 }
 0x11c   : > { %v536_v32 = vmul.f32 %v534_v30, %v517_v21 }
 0x11e   : > { %v537_v33 = vpack.c.bf16 %v536_v32, %v535_v31 }
 0x120   : > { %858 = vmatmul.mubr.msk.bf16.vlgmr.msra.gmra.mrb[0].mxu0 %vm572_vm2, %v537_v33 }
 0x1f3   : > { %v610_v35 = vpop.f32.mrb[0].mxu0 }
 0x1f4   : > { %v617_v37 = vadd.f32 %v610_v35, %v538_v34  ;;  %v859_v38 = vpop.f32.mrb[1].mxu0 }
 0x1f5   : > { %v613_v39 = vpop.f32.mrb[2].mxu0 }
 0x1f6   : > { %619 = vst.msk [vmem:[#allocation2] sm:$0xff] %vm393_vm0, %v617_v37  ;;  %v618_v40 = vadd.f32 %v613_v39, %v539_v36  ;;  %v860_v41 = vpop.f32.mrb[3].mxu0 }
 0x1f8   : > { %620 = vst.msk [vmem:[#allocation2 + $0x8] sm:$0xff] %vm393_vm0, %v618_v40 }
 0x1fd   : > { %v624_v43 = vld [vmem:[#allocation2] sm:$0xff] }
 0x1fe   : > { %v638_v44 = vmul.f32 %v631_v42, %v624_v43 }
 0x1ff   : > { %v625_v46 = vld [vmem:[#allocation2 + $0x8] sm:$0xff] }
 0x200   : > { %v820_v47 = vpack.c.bf16 %v638_v44, %v638_v44  ;;  %v639_v48 = vmul.f32 %v636_v45, %v625_v46 }
 0x202   : > { %649 = vst.msk [vmem:[%s386_s11] sm:$0xf] %vm648_vm3, %v820_v47  ;;  %v821_v49 = vpack.c.bf16 %v639_v48, %v639_v48 }
 0x204   : > { %650 = vst.msk [vmem:[%s386_s11 + $0x4] sm:$0xf] %vm648_vm3, %v821_v49 }
 0x205 PF: > { %s22_s28 = sadd.s32 1, %s943_s28   ;;  %s1062_s26 = smov %s939_s27 }
 0x206   : > { %p19_p13 = scmp.ge.s32.totalorder %s22_s28, 14   ;;  %s1063_s27 = smov %s1065_s0 }
 0x208   :  { %21 = sbr.rel (!%p19_p13) target bundleno = 17 (0x11), region = 90 }

</bundles_post_ra>
